<compile_context>
chip_gen: v7x
topology: tpu7x:2x2x1
jax: 0.10.0
libtpu: 0.0.40
codegen_flags: <defaults>
</compile_context>

<pallas_src>
import functools
import math

import jax
import jax.numpy as jnp
from jax.experimental import pallas as pl
from jax.experimental.pallas import tpu as pltpu

TOK_DIM = 8
LANE = 128
MAX_TILE_B = 16384          # ~ (1.5 KB/elem) * 16K = ~25 MiB -> safe on v7x's 64 MiB


# ----------------------------- Pallas kernel --------------------------------
def _cond_mlp_kernel(x_ref, w1_ref, b1_ref, w2_ref, b2_ref, w3_ref, b3_ref,
                     w4_ref, b4_ref, out_ref, *, f_scale, act_last):
    # x tile: (TB, d_in) bf16, batch-major.  Weights are pre-transposed to
    # (in, out) in the wrapper, so no B-sized transpose exists anywhere.
    h = jnp.dot(x_ref[...], w1_ref[...],
                preferred_element_type=jnp.float32) + b1_ref[...]      # (TB, hid) f32
    h = jnp.maximum(h, 0.0).astype(jnp.bfloat16)
    h = jnp.dot(h, w2_ref[...],
                preferred_element_type=jnp.float32) + b2_ref[...]      # bf16 x bf16 -> f32
    h = jnp.maximum(h, 0.0).astype(jnp.bfloat16)
    h = jnp.dot(h, w3_ref[...],
                preferred_element_type=jnp.float32) + b3_ref[...]
    h = jnp.maximum(h, 0.0)                                            # keep f32

    # Final Linear(hid -> 1): broadcast-multiply by the (1, hid) row + lane
    # reduce (XLU slot has slack) instead of an N=1 MXU matmul.
    y = jnp.sum(h * w4_ref[...], axis=1, keepdims=True) + b4_ref[0, 0]  # (TB, 1)

    if act_last == "relu":
        y = jnp.maximum(y, 0.0)
    elif act_last == "tanh":
        y = jnp.tanh(y)
    if f_scale != 1.0:          # only when it could not be folded into W4/b4
        y = y * f_scale

    out_ref[...] = y.astype(out_ref.dtype)


# ------------------------------ glue + wrapper -------------------------------
def make_pos_encoding_consts(dim=TOK_DIM, base=10000.0, bias=0.0):
    i = jnp.arange(dim, dtype=jnp.float32)
    expo = (i - (i % 2)) / dim
    scale = base ** (-expo)                              # 10000^{-(k - k%2)/dim}
    sft = jnp.where((i % 2) == 1, math.pi / 2.0 + bias, bias)
    return scale, sft


def init_params(key, n_choices, discrete_dim, embed_dim):
    """PyTorch-layout params: w{i} is (out, in), b{i} is (out,)."""
    d_in = discrete_dim * TOK_DIM
    h = embed_dim * 2
    dims = [d_in, h, h, h, 1]
    keys = jax.random.split(key, 1 + 2 * (len(dims) - 1))

    params = {"embed": jax.random.normal(keys[0], (n_choices, TOK_DIM),
                                         dtype=jnp.float32)}      # nn.Embedding ~ N(0,1)
    for li in range(4):
        fan_in, fan_out = dims[li], dims[li + 1]
        bound = 1.0 / math.sqrt(fan_in)
        params[f"w{li+1}"] = jax.random.uniform(
            keys[1 + 2 * li], (fan_out, fan_in),
            minval=-bound, maxval=bound, dtype=jnp.float32)
        params[f"b{li+1}"] = jax.random.uniform(
            keys[2 + 2 * li], (fan_out,),
            minval=-bound, maxval=bound, dtype=jnp.float32)
    return params


def cond_mlp_score(pos_list, samples, params, *, f_scale, act_last=None,
                   tile_b=8192):
    bsize0, D = pos_list.shape
    B = samples.shape[0]
    assert B % bsize0 == 0, (B, bsize0)
    d_in = D * TOK_DIM
    hid = params["w1"].shape[0]

    # --- batch tiling: lane-aligned tiles, clamped for VMEM (v7x = 64 MiB
    #     physical) and kept to >= 2 grid steps when possible (v7x: 2 TCs). ---
    tile_b = int(tile_b)
    b_ceil = -(-B // LANE) * LANE
    tile_b = max(LANE, min(tile_b, MAX_TILE_B, b_ceil))
    tile_b = (tile_b // LANE) * LANE
    if b_ceil >= 2 * LANE:
        half = -(-(b_ceil // LANE) // 2) * LANE          # ceil(b_ceil/2), lane-aligned
        tile_b = min(tile_b, half)
    B_pad = -(-B // tile_b) * tile_b
    grid = (B_pad // tile_b,)

    # Rough per-element VMEM: 2x bf16 x-buffers (512 B) + f32/bf16 h intermediates
    # (~1 KB) + output (~8 B).  Leave headroom; never exceed 48 MiB (v7x-safe).
    vmem_limit = int(min(48 * 1024 * 1024,
                         max(24 * 1024 * 1024, 2048 * tile_b + (2 << 20))))

    # --- producer glue (one XLA fusion): pad the SMALL int32 samples for the
    #     batch remainder, gather the embedding, add the (tiny, row-gathered)
    #     sinusoidal PE table, cast bf16.  Batch-major -> no B-sized transpose.
    scale, sft = make_pos_encoding_consts()
    pos_pe = jnp.sin(pos_list.astype(jnp.float32)[:, :, None] * scale + sft)   # (b0, D, 8)
    pe_rows = pos_pe.reshape(bsize0, d_in)                                     # tiny table
    samples_p = samples
    if B_pad != B:
        samples_p = jnp.pad(samples, ((0, B_pad - B), (0, 0)))                 # index 0 is valid
    row = jnp.arange(B_pad, dtype=jnp.int32) % bsize0                          # repeat() semantics
    tok = params["embed"][samples_p].reshape(B_pad, d_in)
    x = (tok + pe_rows[row]).astype(jnp.bfloat16)                              # (B_pad, d_in) bf16

    # --- one-time parameter prep (transpose tiny weights, bf16, fold f_scale) --
    w1 = params["w1"].T.astype(jnp.bfloat16)             # (d_in, hid)
    b1 = params["b1"].reshape(1, hid)
    w2 = params["w2"].T.astype(jnp.bfloat16)             # (hid, hid)
    b2 = params["b2"].reshape(1, hid)
    w3 = params["w3"].T.astype(jnp.bfloat16)
    b3 = params["b3"].reshape(1, hid)
    w4 = params["w4"].reshape(1, hid)                    # f32 row
    b4 = params["b4"].reshape(1, 1)
    kernel_scale = float(f_scale)
    if act_last is None and kernel_scale != 1.0:         # fold scale into last layer
        w4 = w4 * kernel_scale
        b4 = b4 * kernel_scale
        kernel_scale = 1.0

    kernel = functools.partial(_cond_mlp_kernel, f_scale=kernel_scale,
                               act_last=act_last)
    full = lambda i: (0, 0)

    out = pl.pallas_call(
        kernel,
        out_shape=jax.ShapeDtypeStruct((B_pad, 1), jnp.float32),
        grid=grid,
        in_specs=[
            pl.BlockSpec((tile_b, d_in), lambda i: (i, 0)),      # x tile (bf16, batch-major)
            pl.BlockSpec((d_in, hid), full),                     # W1^T (bf16)
            pl.BlockSpec((1, hid), full),                        # b1
            pl.BlockSpec((hid, hid), full),                      # W2^T (bf16)
            pl.BlockSpec((1, hid), full),                        # b2
            pl.BlockSpec((hid, hid), full),                      # W3^T (bf16)
            pl.BlockSpec((1, hid), full),                        # b3
            pl.BlockSpec((1, hid), full),                        # W4 row (f_scale folded)
            pl.BlockSpec(memory_space=pltpu.MemorySpace.SMEM),   # b4 scalar
        ],
        out_specs=pl.BlockSpec((tile_b, 1), lambda i: (i, 0)),
        compiler_params=pltpu.CompilerParams(
            dimension_semantics=("parallel",),
            vmem_limit_bytes=vmem_limit),
    )(x, w1, b1, w2, b2, w3, b3, w4, b4)

    return out[:B]                                               # (B, 1)


# pure-JAX reference (full f32, matches the PyTorch module) for a correctness check
def cond_mlp_score_ref(pos_list, samples, params, *, f_scale, act_last=None):
    bsize = pos_list.shape[0]
    if samples.shape[0] != bsize:
        pos_list = jnp.tile(pos_list, (samples.shape[0] // bsize, 1))
        bsize = samples.shape[0]
    d_in = samples.shape[1] * TOK_DIM
    scale, sft = make_pos_encoding_consts()
    pos_embed = jnp.sin(pos_list.astype(jnp.float32)[..., None] * scale + sft
                        ).reshape(bsize, d_in)
    tok_embed = params["embed"][samples].reshape(bsize, d_in)
    x = pos_embed + tok_embed
    hp = jax.lax.Precision.HIGHEST
    h = jax.nn.relu(jnp.dot(x, params["w1"].T, precision=hp) + params["b1"])
    h = jax.nn.relu(jnp.dot(h, params["w2"].T, precision=hp) + params["b2"])
    h = jax.nn.relu(jnp.dot(h, params["w3"].T, precision=hp) + params["b3"])
    y = jnp.dot(h, params["w4"].T, precision=hp) + params["b4"]
    if act_last == "relu":
        y = jax.nn.relu(y)
    elif act_last == "tanh":
        y = jnp.tanh(y)
    return y * f_scale


if __name__ == "__main__":
    n_choices = 256      # e.g. byte-valued tokens
    discrete_dim = 16
    embed_dim = 32       # -> hidden width 64, input width 16*8 = 128
    act_last = None
    f_scale = 2.0

    key = jax.random.PRNGKey(0)
    ks, kw = jax.random.split(key, 2)

    params = init_params(kw, n_choices, discrete_dim, embed_dim)

    # pos_list batch = 8, samples batch = 200 -> exercises the repeat() branch,
    # the tile_b clamp (8192 -> 128), a 2-step grid and the batch-remainder
    # padding path (pad applied to the small int32 samples, not the activation).
    pos_list = jnp.tile(jnp.arange(discrete_dim, dtype=jnp.int32)[None, :], (8, 1))
    samples = jax.random.randint(ks, (200, discrete_dim), 0, n_choices,
                                 dtype=jnp.int32)

    out = cond_mlp_score(pos_list, samples, params,
                         f_scale=f_scale, act_last=act_last)
    out = jax.block_until_ready(out)

    ref = cond_mlp_score_ref(pos_list, samples, params,
                             f_scale=f_scale, act_last=act_last)
    assert out.shape == (200, 1), out.shape
    # bf16-streamed activations / bf16 weights => tolerance loosened vs full-f32 ref
    assert jnp.allclose(out, ref, atol=2e-2, rtol=2e-2), (out[:4], ref[:4])
    print("KERNEL_OK")
</pallas_src>

<mosaic_0001>
module attributes {stable_mosaic.version = 11 : i64} {
  func.func @_cond_mlp_kernel(%arg0: i32, %arg1: memref<128x128xbf16, #tpu.memory_space<vmem>>, %arg2: memref<128x64xbf16, #tpu.memory_space<vmem>>, %arg3: memref<1x64xf32, #tpu.memory_space<vmem>>, %arg4: memref<64x64xbf16, #tpu.memory_space<vmem>>, %arg5: memref<1x64xf32, #tpu.memory_space<vmem>>, %arg6: memref<64x64xbf16, #tpu.memory_space<vmem>>, %arg7: memref<1x64xf32, #tpu.memory_space<vmem>>, %arg8: memref<1x64xf32, #tpu.memory_space<vmem>>, %arg9: memref<1x1xf32, #tpu.memory_space<smem>>, %arg10: memref<128x1xf32, #tpu.memory_space<vmem>>) attributes {dimension_semantics = [#tpu.dimension_semantics<parallel>], iteration_bounds = array<i64: 2>, scalar_prefetch = 0 : i64, scratch_operands = 0 : i64, tpu.core_type = #tpu.core_type<tc>, window_params = [{transform_indices = @transform_0, window_bounds = array<i64: 128, 128>}, {pipeline_mode = #tpu.pipeline_mode<synchronous>, transform_indices = @transform_1, window_bounds = array<i64: 128, 64>}, {pipeline_mode = #tpu.pipeline_mode<synchronous>, transform_indices = @transform_2, window_bounds = array<i64: 1, 64>}, {pipeline_mode = #tpu.pipeline_mode<synchronous>, transform_indices = @transform_3, window_bounds = array<i64: 64, 64>}, {pipeline_mode = #tpu.pipeline_mode<synchronous>, transform_indices = @transform_4, window_bounds = array<i64: 1, 64>}, {pipeline_mode = #tpu.pipeline_mode<synchronous>, transform_indices = @transform_5, window_bounds = array<i64: 64, 64>}, {pipeline_mode = #tpu.pipeline_mode<synchronous>, transform_indices = @transform_6, window_bounds = array<i64: 1, 64>}, {pipeline_mode = #tpu.pipeline_mode<synchronous>, transform_indices = @transform_7, window_bounds = array<i64: 1, 64>}, {transform_indices = @transform_8, window_bounds = array<i64: 1, 1>}, {transform_indices = @transform_9, window_bounds = array<i64: 128, 1>}]} {
    %c0 = arith.constant 0 : index
    %c0_0 = arith.constant 0 : index
    %0 = vector.load %arg1[%c0, %c0_0] : memref<128x128xbf16, #tpu.memory_space<vmem>>, vector<128x128xbf16>
    %c0_1 = arith.constant 0 : index
    %c0_2 = arith.constant 0 : index
    %1 = vector.load %arg2[%c0_1, %c0_2] : memref<128x64xbf16, #tpu.memory_space<vmem>>, vector<128x64xbf16>
    %cst = arith.constant dense<0.000000e+00> : vector<128x64xf32>
    %2 = tpu.matmul %0, %1, %cst {dimension_numbers = #tpu.dot_dimension_numbers<[1], [0], [0], [1], [0, 0, 1, 1], [], []>} : vector<128x128xbf16>, vector<128x64xbf16>, vector<128x64xf32> -> vector<128x64xf32>
    %c0_3 = arith.constant 0 : index
    %c0_4 = arith.constant 0 : index
    %3 = vector.load %arg3[%c0_3, %c0_4] : memref<1x64xf32, #tpu.memory_space<vmem>>, vector<1x64xf32>
    %4 = vector.broadcast %3 : vector<1x64xf32> to vector<128x64xf32>
    %5 = arith.addf %2, %4 : vector<128x64xf32>
    %cst_5 = arith.constant 0.000000e+00 : f32
    %6 = vector.broadcast %cst_5 : f32 to vector<128x64xf32>
    %7 = arith.maximumf %5, %6 : vector<128x64xf32>
    %8 = arith.truncf %7 : vector<128x64xf32> to vector<128x64xbf16>
    %c0_6 = arith.constant 0 : index
    %c0_7 = arith.constant 0 : index
    %9 = vector.load %arg4[%c0_6, %c0_7] : memref<64x64xbf16, #tpu.memory_space<vmem>>, vector<64x64xbf16>
    %cst_8 = arith.constant dense<0.000000e+00> : vector<128x64xf32>
    %10 = tpu.matmul %8, %9, %cst_8 {dimension_numbers = #tpu.dot_dimension_numbers<[1], [0], [0], [1], [0, 0, 1, 1], [], []>} : vector<128x64xbf16>, vector<64x64xbf16>, vector<128x64xf32> -> vector<128x64xf32>
    %c0_9 = arith.constant 0 : index
    %c0_10 = arith.constant 0 : index
    %11 = vector.load %arg5[%c0_9, %c0_10] : memref<1x64xf32, #tpu.memory_space<vmem>>, vector<1x64xf32>
    %12 = vector.broadcast %11 : vector<1x64xf32> to vector<128x64xf32>
    %13 = arith.addf %10, %12 : vector<128x64xf32>
    %cst_11 = arith.constant 0.000000e+00 : f32
    %14 = vector.broadcast %cst_11 : f32 to vector<128x64xf32>
    %15 = arith.maximumf %13, %14 : vector<128x64xf32>
    %16 = arith.truncf %15 : vector<128x64xf32> to vector<128x64xbf16>
    %c0_12 = arith.constant 0 : index
    %c0_13 = arith.constant 0 : index
    %17 = vector.load %arg6[%c0_12, %c0_13] : memref<64x64xbf16, #tpu.memory_space<vmem>>, vector<64x64xbf16>
    %cst_14 = arith.constant dense<0.000000e+00> : vector<128x64xf32>
    %18 = tpu.matmul %16, %17, %cst_14 {dimension_numbers = #tpu.dot_dimension_numbers<[1], [0], [0], [1], [0, 0, 1, 1], [], []>} : vector<128x64xbf16>, vector<64x64xbf16>, vector<128x64xf32> -> vector<128x64xf32>
    %c0_15 = arith.constant 0 : index
    %c0_16 = arith.constant 0 : index
    %19 = vector.load %arg7[%c0_15, %c0_16] : memref<1x64xf32, #tpu.memory_space<vmem>>, vector<1x64xf32>
    %20 = vector.broadcast %19 : vector<1x64xf32> to vector<128x64xf32>
    %21 = arith.addf %18, %20 : vector<128x64xf32>
    %cst_17 = arith.constant 0.000000e+00 : f32
    %22 = vector.broadcast %cst_17 : f32 to vector<128x64xf32>
    %23 = arith.maximumf %21, %22 : vector<128x64xf32>
    %c0_18 = arith.constant 0 : index
    %c0_19 = arith.constant 0 : index
    %24 = vector.load %arg8[%c0_18, %c0_19] : memref<1x64xf32, #tpu.memory_space<vmem>>, vector<1x64xf32>
    %25 = vector.broadcast %24 : vector<1x64xf32> to vector<128x64xf32>
    %26 = arith.mulf %23, %25 : vector<128x64xf32>
    %cst_20 = arith.constant dense<0.000000e+00> : vector<128xf32>
    %27 = vector.multi_reduction <add>, %26, %cst_20 [1] : vector<128x64xf32> to vector<128xf32>
    %28 = vector.shape_cast %27 : vector<128xf32> to vector<128x1xf32>
    %c0_21 = arith.constant 0 : index
    %c0_22 = arith.constant 0 : index
    %29 = memref.load %arg9[%c0_21, %c0_22] : memref<1x1xf32, #tpu.memory_space<smem>>
    %30 = vector.broadcast %29 : f32 to vector<128x1xf32>
    %31 = arith.addf %28, %30 : vector<128x1xf32>
    %c0_23 = arith.constant 0 : index
    %c0_24 = arith.constant 0 : index
    %32 = vector.load %arg10[%c0_23, %c0_24] : memref<128x1xf32, #tpu.memory_space<vmem>>, vector<128x1xf32>
    tpu.vector_store %arg10[%c0_23, %c0_24], %31 {strides = array<i32>} : memref<128x1xf32, #tpu.memory_space<vmem>>, vector<128x1xf32>,
    return
  }
  func.func @transform_0(%arg0: i32) -> (i32, i32) {
    %c0_i32 = arith.constant 0 : i32
    %c0_i32_0 = arith.constant 0 : i32
    return %arg0, %c0_i32 : i32, i32
  }
  func.func @transform_1(%arg0: i32) -> (i32, i32) {
    %c0_i32 = arith.constant 0 : i32
    %c0_i32_0 = arith.constant 0 : i32
    %c0_i32_1 = arith.constant 0 : i32
    return %c0_i32, %c0_i32_0 : i32, i32
  }
  func.func @transform_2(%arg0: i32) -> (i32, i32) {
    %c0_i32 = arith.constant 0 : i32
    %c0_i32_0 = arith.constant 0 : i32
    %c0_i32_1 = arith.constant 0 : i32
    return %c0_i32, %c0_i32_0 : i32, i32
  }
  func.func @transform_3(%arg0: i32) -> (i32, i32) {
    %c0_i32 = arith.constant 0 : i32
    %c0_i32_0 = arith.constant 0 : i32
    %c0_i32_1 = arith.constant 0 : i32
    return %c0_i32, %c0_i32_0 : i32, i32
  }
  func.func @transform_4(%arg0: i32) -> (i32, i32) {
    %c0_i32 = arith.constant 0 : i32
    %c0_i32_0 = arith.constant 0 : i32
    %c0_i32_1 = arith.constant 0 : i32
    return %c0_i32, %c0_i32_0 : i32, i32
  }
  func.func @transform_5(%arg0: i32) -> (i32, i32) {
    %c0_i32 = arith.constant 0 : i32
    %c0_i32_0 = arith.constant 0 : i32
    %c0_i32_1 = arith.constant 0 : i32
    return %c0_i32, %c0_i32_0 : i32, i32
  }
  func.func @transform_6(%arg0: i32) -> (i32, i32) {
    %c0_i32 = arith.constant 0 : i32
    %c0_i32_0 = arith.constant 0 : i32
    %c0_i32_1 = arith.constant 0 : i32
    return %c0_i32, %c0_i32_0 : i32, i32
  }
  func.func @transform_7(%arg0: i32) -> (i32, i32) {
    %c0_i32 = arith.constant 0 : i32
    %c0_i32_0 = arith.constant 0 : i32
    %c0_i32_1 = arith.constant 0 : i32
    return %c0_i32, %c0_i32_0 : i32, i32
  }
  func.func @transform_8(%arg0: i32) -> (i32, i32) {
    %c0_i32 = arith.constant 0 : i32
    %c0_i32_0 = arith.constant 0 : i32
    %c0_i32_1 = arith.constant 0 : i32
    return %c0_i32, %c0_i32_0 : i32, i32
  }
  func.func @transform_9(%arg0: i32) -> (i32, i32) {
    %c0_i32 = arith.constant 0 : i32
    %c0_i32_0 = arith.constant 0 : i32
    return %arg0, %c0_i32 : i32, i32
  }
}

</mosaic_0001>

<bundles_post_ra>
// kernel: tpu_custom_call.1
= control target key start
LH: loop header
LB: loop body
LE: loop exit
PB: predicated region body
PF: predicated region fallthrough
CT: control target
= control target key end

     0   :  { %s1817_s0 = inlined_call_operand.hbm [shape: bf16[256,128], index: 0, kind: input, shape index: {}]   ;;  %s1818_s1 = inlined_call_operand.vmem [shape: bf16[128,64], index: 1, kind: input, shape index: {}]   ;;  %s1819_s2 = inlined_call_operand.vmem [shape: f32[1,64], index: 2, kind: input, shape index: {}]   ;;  %s1820_s3 = inlined_call_operand.vmem [shape: bf16[64,64], index: 3, kind: input, shape index: {}]   ;;  %s1821_s4 = inlined_call_operand.vmem [shape: f32[1,64], index: 4, kind: input, shape index: {}]   ;;  %s1822_s5 = inlined_call_operand.vmem [shape: bf16[64,64], index: 5, kind: input, shape index: {}]   ;;  %s1823_s6 = inlined_call_operand.vmem [shape: f32[1,64], index: 6, kind: input, shape index: {}]   ;;  %s1824_s7 = inlined_call_operand.vmem [shape: f32[1,64], index: 7, kind: input, shape index: {}]   ;;  %s1825_s8 = inlined_call_operand.<no memory space> [shape: f32[1,1], index: 8, kind: input, shape index: {}]   ;;  %s1826_s9 = inlined_call_operand.vmem [shape: f32[256,1], index: 9, kind: output, shape index: {}]  }
   0x1   :  { %14 = sst [smem:[#allocation2]] %s1825_s8 }
   0x2   :  { %15 = vsyncpa [#allocation4], 0 }
   0x3   :  { %17 = vsyncpa [#allocation4 + $0x1], 0  ;;  %s1520_s11 = smov 0   ;;  %s1522_s12 = smov 0  }
   0x4   :  { %s1524_s13 = smov 0   ;;  %s1526_s14 = smov 0  }
   0x5 LB: > { %s1147_s8 = sadd.s32 4294967295, %s1462_s14   ;;  %s1540_s15 = sadd.s32 1, %s1462_s14   ;;  %s1462_s14 = sphi %s1526_s14, %s1833_s14   ;;  %s1458_s13 = sphi %s1524_s13, %s1832_s13   ;;  %s1454_s12 = sphi %s1522_s12, %s1831_s12   ;;  %s1450_s11 = sphi %s1520_s11, %s1830_s11  }
   0x6   : > { %s27_s16 = ssub.s32 %s1462_s14, %s1540_s15  ;;  %s30_s17 = sadd.s32 1, %s1458_s13 }
   0x7   : > { %p28_p0 = scmp.eq.s32.totalorder %s27_s16, 0  ;;  %p37_p1 = scmp.ne.s32.totalorder %s1458_s13, %s1454_s12 }
   0x8   : > { %p38_p2 = scmp.eq.s32.totalorder %s1462_s14, 0  ;;  %p43_p3 = scmp.ne.s32.totalorder %s1454_s12, %s1450_s11 }
   0x9   : > { %s1550_s18 = scalar_select %p28_p0, %s1458_s13, %s30_s17  }
   0xa   : > { %p39_p4 = por %p38_p2, %p37_p1  ;;  %p44_p5 = scmp.eq.s32.totalorder %s1147_s8, 0 }
   0xb   : > { %p1339_p6 = scmp.lt.s32.totalorder %s1462_s14, 2  ;;  %s285_s20 = sand.u32 1, %s1458_s13  }
   0xc   : > { %p1555_p7 = por %p44_p5, %p43_p3  ;;  %s1151_s21 = sshll.u32 %s285_s20, 6 }
   0xd   : > { %s1204_s22 = sshll.u32 %s1462_s14, 10  ;;  %s289_s26 = scalar_lea.vmem [#allocation3], %s1151_s21 }
   0xe   : > { %s1564_s25 = scalar_lea.hbm %s1817_s0, %s1204_s22  ;;  %s296_s27 = sshll.u32 %s289_s26, 4  ;;  %s1566_s27 = int_to_ptr.vmem [resolvable:$true] %s296_s27 }
   0xf   : > { %p1568_p8 = pnand %p1339_p6, %p39_p4  ;;  %s1573_s29 = scalar_lea.sflag [#allocation4], %s285_s20 }
  0x10   : > { %s1398_s30 = scalar_lea.hbm %s1564_s25, 1024  ;;  %s1403_s16 = scalar_lea.hbm %s1817_s0, 2048 }
  0x11   : > { %p1399_p10 = scmp.ne.s32.totalorder %s1564_s25, %s1398_s30  ;;  %p1400_p11 = pneg %p1568_p8 }
  0x12   : > { %p1404_p0 = scmp.lt.u32.totalorder %s1564_s25, %s1817_s0  ;;  %p1405_p1 = scmp.lt.u32.totalorder %s1403_s16, %s1398_s30 }
  0x13   : > { %p1401_p12 = pnand %p1400_p11, %p1399_p10  ;;  %p1407_p3 = scmp.lt.u32.totalorder %s1398_s30, %s1564_s25 }
  0x14   : > { %p1406_p2 = por %p1405_p1, %p1404_p0 }
  0x15   : > { %p1402_p13 = pneg %p1401_p12 }
  0x16   : > { %p1408_p4 = por %p1407_p3, %p1406_p2 }
  0x18   : > { %p1409_p5 = pnand %p1408_p4, %p1402_p13 }
  0x1a   : > { %1412 = shalt.err (!%p1409_p5)
}
  0x1b   : > { %s1413_s20 = scalar_lea.vmem %s1566_s27, 1024  ;;  %s1464_s22 = smov [#allocation3]  }
  0x1c   : > { %p1414_p6 = scmp.ne.s32.totalorder %s1566_s27, %s1413_s20  ;;  %s1418_s23 = sshll.u32 %s1464_s22, 4  ;;  %s1419_s23 = int_to_ptr.vmem [resolvable:$false] %s1418_s23 }
  0x1d   : > { %s1420_s24 = scalar_lea.vmem %s1419_s23, 2048  ;;  %p1421_p9 = scmp.lt.s32.totalorder %s1566_s27, %s1419_s23 }
  0x1e   : > { %p1416_p10 = pnand %p1414_p6, %p1400_p11  ;;  %p1422_p0 = scmp.lt.s32.totalorder %s1420_s24, %s1413_s20 }
  0x20   : > { %p1417_p12 = pneg %p1416_p10  ;;  %p1423_p1 = por %p1422_p0, %p1421_p9 }
  0x22   : > { %p1424_p2 = pnand %p1423_p1, %p1417_p12 }
  0x24   : > { %1427 = shalt.err (!%p1424_p2)
}
  0x25   : > { %s1465_s26 = smov 64   ;;  %s1466_s30 = smov 4  }
  0x26   : > { %1338 = dma.hbm_to_vmem [thread:$0]  (!%p1568_p8), %s1564_s25, 1024, %s1566_s27, %s1573_s29, %s1465_s26, %s1465_s26, %s1466_s30  }
  0x27   : > { %p304_p11 = scmp.lt.s32.totalorder %s1462_s14, 3  ;;  %p1829_p13 = scmp.ge.s32.totalorder %s1462_s14, 1 }
  0x29   : > { %p305_p3 = pnand %p1829_p13, %p304_p11 }
  0x2a   : > { %s310_s10 = sand.u32 (!%p305_p3), 1, %s1454_s12  }
  0x2b   : > { %308 = sbr.rel (%p305_p3) target bundleno = 923 (0x39b), region = 56  ;;  %s1155_s11 = sshll.u32 (!%p305_p3), %s310_s10, 6 }
  0x2c   : > { %s311_s16 = scalar_lea.sflag (!%p305_p3), [#allocation4], %s310_s10  ;;  %s1605_s17 = scalar_lea.vmem (!%p305_p3), [#allocation3], %s1155_s11 }
  0x32   : > { %1445 = dma.done.wait (%p1555_p7), %s311_s16, 1024  }
  0x33   : > { %1447 = vsyncadd (%p1555_p7), %s311_s16, 4294966272  ;;  %v1374_v0 = vld [vmem:[%s1818_s1] sm:$0xff]   ;;  %v1375_v1 = vld [vmem:[%s1818_s1 + $0x8] sm:$0xff]   ;;  %vm652_vm0 = vcmask 523264   ;;  %s1156_s24 = sshll.u32 %s1147_s8, 4  ;;  %s1045_s26 = sld [smem:[#allocation2]] }
  0x34   : > { %1245 = vmatprep.subr.bf16.mxu0 %v1374_v0  ;;  %v1376_v2 = vld [vmem:[%s1818_s1 + $0x10] sm:$0xff]   ;;  %v1377_v3 = vld [vmem:[%s1818_s1 + $0x18] sm:$0xff]   ;;  %v1382_v4 = vld [vmem:[%s1605_s17] sm:$0xff]   ;;  %p351_p7 = scmp.lt.s32.totalorder %s1156_s24, 31  ;;  %vm1063_vm1 = vcmask 7168  }
  0x35   : > { %1246 = vmatpush3.bf16.msra.mxu0 %v1374_v0  ;;  %1261 = vmatprep.mubr.bf16.mxu0 %v1382_v4  ;;  %v1378_v5 = vld [vmem:[%s1818_s1 + $0x20] sm:$0xff]   ;;  %v1379_v6 = vld [vmem:[%s1818_s1 + $0x28] sm:$0xff]   ;;  %v1380_v8 = vld [vmem:[%s1818_s1 + $0x30] sm:$0xff]  }
  0x36   : > { %1247 = vmatprep.subr.bf16.mxu0 %v1375_v1  ;;  %v1390_v7 = vld [vmem:[%s1820_s3] sm:$0xff]   ;;  %v1391_v9 = vld [vmem:[%s1820_s3 + $0x8] sm:$0xff]   ;;  %v1392_v10 = vld [vmem:[%s1820_s3 + $0x10] sm:$0xff]   ;;  %s1835_s24 = smov (!%p351_p7, %s1156_s24), 31 }
  0x37   : > { %1325 = vmatprep.subr.bf16.mxu1 %v1390_v7  ;;  %v1381_v11 = vld [vmem:[%s1818_s1 + $0x38] sm:$0xff]   ;;  %v1383_v12 = vld [vmem:[%s1605_s17 + $0x8] sm:$0xff]   ;;  %v1384_v13 = vld [vmem:[%s1605_s17 + $0x10] sm:$0xff]   ;;  %s1157_s30 = sshll.u32 %s1835_s24, 3 }
  0x38   : > { %1329 = vmatpush3.bf16.msra.mxu1 %v1390_v7  ;;  %v1385_v14 = vld [vmem:[%s1605_s17 + $0x18] sm:$0xff]   ;;  %v1386_v15 = vld [vmem:[%s1605_s17 + $0x20] sm:$0xff]   ;;  %v1387_v16 = vld [vmem:[%s1605_s17 + $0x28] sm:$0xff]   ;;  %s1770_s11 = scalar_lea.vmem %s1826_s9, %s1157_s30 }
  0x39   : > { %1248 = vmatpush3.bf16.msra.mxu0 %v1375_v1  ;;  %1326 = vmatprep.subr.bf16.mxu1 %v1391_v9  ;;  %v1388_v17 = vld [vmem:[%s1605_s17 + $0x30] sm:$0xff]   ;;  %v1389_v18 = vld [vmem:[%s1605_s17 + $0x38] sm:$0xff]   ;;  %v1394_v20 = vld [vmem:[%s1822_s5] sm:$0xff]  }
  0x3a   : > { %1249 = vmatprep.subr.bf16.mxu0 %v1376_v2  ;;  %v1393_v19 = vld [vmem:[%s1820_s3 + $0x18] sm:$0xff]   ;;  %v1661_v21 = vld [vmem:[%s1819_s2] ss:$0 sm:$0xff]  ;;  %v1395_v53 = vld [vmem:[%s1822_s5 + $0x8] sm:$0xff]  }
  0x3b   : > { %v1396_v61 = vld [vmem:[%s1822_s5 + $0x10] sm:$0xff]  }
  0x3c   : > { %1330 = vmatpush3.bf16.msra.mxu1 %v1391_v9 }
  0x3d   : > { %1250 = vmatpush3.bf16.msra.mxu0 %v1376_v2  ;;  %1327 = vmatprep.subr.bf16.mxu1 %v1392_v10 }
  0x3e   : > { %1251 = vmatprep.subr.bf16.mxu0 %v1377_v3 }
  0x40   : > { %1331 = vmatpush3.bf16.msra.mxu1 %v1392_v10 }
  0x41   : > { %1252 = vmatpush3.bf16.msra.mxu0 %v1377_v3  ;;  %1328 = vmatprep.subr.bf16.mxu1 %v1393_v19 }
  0x42   : > { %1253 = vmatprep.subr.bf16.mxu0 %v1378_v5 }
  0x44   : > { %1332 = vmatpush3.bf16.msra.mxu1 %v1393_v19 }
  0x45   : > { %1254 = vmatpush3.bf16.msra.mxu0 %v1378_v5  ;;  %1301 = vmatprep.subr.bf16.mxu1 %v1394_v20 }
  0x46   : > { %1255 = vmatprep.subr.bf16.mxu0 %v1379_v6 }
  0x49   : > { %1256 = vmatpush3.bf16.msra.mxu0 %v1379_v6 }
  0x4a   : > { %1257 = vmatprep.subr.bf16.mxu0 %v1380_v8 }
  0x4d   : > { %1258 = vmatpush3.bf16.msra.mxu0 %v1380_v8 }
  0x4e   : > { %1259 = vmatprep.subr.bf16.mxu0 %v1381_v11 }
  0x51   : > { %1260 = vmatpush3.bf16.msra.mxu0 %v1381_v11 }
  0x52   : > { %1277 = vmatprep.subr.bf16.mxu0 %v1390_v7 }
  0x54   : > { %1262 = vmatmul.mubr.bf16.vlgmr.msra.gmra.mrb[0].mxu0 %v1383_v12 }
  0x55   : > { %1265 = vmatprep.mubr.bf16.mxu0 %v1384_v13  ;;  %1278 = vmatpush3.bf16.msra.mxu0 %v1390_v7 }
  0x56   : > { %1279 = vmatprep.subr.bf16.mxu0 %v1391_v9 }
  0x59   : > { %1280 = vmatpush3.bf16.msra.mxu0 %v1391_v9 }
  0x5a   : > { %1281 = vmatprep.subr.bf16.mxu0 %v1392_v10 }
  0x5c   : > { %1266 = vmatmul.mubr.bf16.gmra.mrb[4].mxu0 %v1385_v14 }
  0x5d   : > { %1269 = vmatprep.mubr.bf16.mxu0 %v1386_v15  ;;  %1282 = vmatpush3.bf16.msra.mxu0 %v1392_v10 }
  0x5e   : > { %1283 = vmatprep.subr.bf16.mxu0 %v1393_v19 }
  0x61   : > { %1284 = vmatpush3.bf16.msra.mxu0 %v1393_v19 }
  0x64   : > { %1270 = vmatmul.mubr.bf16.gmra.mrb[8].mxu0 %v1387_v16  ;;  %v1397_v16 = vld [vmem:[%s1822_s5 + $0x18] sm:$0xff]  }
  0x65   : > { %1273 = vmatprep.mubr.bf16.mxu0 %v1388_v17  ;;  %v1175_v17 = vld [vmem:[%s1821_s4] ss:$0 sm:$0xff] }
  0x6c   : > { %1274 = vmatmul.mubr.bf16.gmra.mrb[12].mxu0 %v1389_v18 }
 0x127   : > { %v1263_v22 = vpop.f32.mrb[0].mxu0 }
 0x128   : > { %v535_v23 = vadd.f32 %v1263_v22, %v1661_v21  ;;  %v526_v24 = vpop.f32.mrb[1].mxu0 }
 0x129   : > { %v527_v25 = vadd.f32 %v1661_v21, %v526_v24  ;;  %v1264_v26 = vpop.f32.mrb[2].mxu0 }
 0x12a   : > { %v538_v27 = vadd.f32 %v1264_v26, %v1661_v21  ;;  %v529_v28 = vpop.f32.mrb[3].mxu0  ;;  %v591_v30 = vmax.f32 %v535_v23, 0.0 }
 0x12b   : > { %v530_v29 = vadd.f32 %v1661_v21, %v529_v28  ;;  %v589_v32 = vmax.f32 %v527_v25, 0.0 }
 0x12c   : > { %v592_v31 = vmax.f32 %v538_v27, 0.0 }
 0x12d   : > { %v590_v33 = vmax.f32 %v530_v29, 0.0 }
 0x12e   : > { %v606_v34 = vpack.c.bf16 %v592_v31, %v591_v30 }
 0x12f   : > { %v605_v35 = vpack.c.bf16 %v590_v33, %v589_v32  ;;  %v1267_v36 = vpop.f32.mrb[4].mxu0 }
 0x130   : > { %v551_v37 = vadd.f32 %v1267_v36, %v1661_v21  ;;  %v542_v38 = vpop.f32.mrb[5].mxu0 }
 0x131   : > { %v543_v39 = vadd.f32 %v1661_v21, %v542_v38  ;;  %v1268_v40 = vpop.f32.mrb[6].mxu0  ;;  %1285 = vmatprep.mubr.msk.bf16.mxu0 %vm652_vm0, %v605_v35 }
 0x132   : > { %v554_v41 = vadd.f32 %v1268_v40, %v1661_v21  ;;  %v545_v42 = vpop.f32.mrb[7].mxu0  ;;  %1286 = vmatmul.mubr.msk.bf16.vlgmr.msra.gmra.mrb[16].mxu0 %vm652_vm0, %v606_v34  ;;  %v595_v44 = vmax.f32 %v551_v37, 0.0 }
 0x133   : > { %v546_v43 = vadd.f32 %v1661_v21, %v545_v42  ;;  %v593_v46 = vmax.f32 %v543_v39, 0.0 }
 0x134   : > { %v596_v45 = vmax.f32 %v554_v41, 0.0 }
 0x135   : > { %v594_v47 = vmax.f32 %v546_v43, 0.0 }
 0x136   : > { %v608_v48 = vpack.c.bf16 %v596_v45, %v595_v44 }
 0x137   : > { %v1271_v49 = vpop.f32.mrb[8].mxu0  ;;  %v607_v50 = vpack.c.bf16 %v594_v47, %v593_v46 }
 0x138   : > { %v567_v51 = vadd.f32 %v1271_v49, %v1661_v21  ;;  %v558_v52 = vpop.f32.mrb[9].mxu0 }
 0x139   : > { %v559_v54 = vadd.f32 %v1661_v21, %v558_v52  ;;  %v1272_v55 = vpop.f32.mrb[10].mxu0  ;;  %1289 = vmatprep.mubr.msk.bf16.mxu1 %vm652_vm0, %v607_v50 }
 0x13a   : > { %v570_v56 = vadd.f32 %v1272_v55, %v1661_v21  ;;  %v561_v57 = vpop.f32.mrb[11].mxu0  ;;  %1290 = vmatmul.mubr.msk.bf16.vlgmr.msra.gmra.mrb[0].mxu1 %vm652_vm0, %v608_v48  ;;  %v599_v59 = vmax.f32 %v567_v51, 0.0 }
 0x13b   : > { %v562_v58 = vadd.f32 %v1661_v21, %v561_v57  ;;  %1302 = vmatpush3.bf16.msra.mxu1 %v1394_v20  ;;  %v597_v62 = vmax.f32 %v559_v54, 0.0 }
 0x13c   : > { %v600_v60 = vmax.f32 %v570_v56, 0.0  ;;  %1303 = vmatprep.subr.bf16.mxu1 %v1395_v53 }
 0x13d   : > { %v598_v63 = vmax.f32 %v562_v58, 0.0 }
 0x13e   : > { %v610_v0 = vpack.c.bf16 %v600_v60, %v599_v59 }
 0x13f   : > { %v609_v1 = vpack.c.bf16 %v598_v63, %v597_v62  ;;  %v1275_v2 = vpop.f32.mrb[12].mxu0  ;;  %1304 = vmatpush3.bf16.msra.mxu1 %v1395_v53 }
 0x140   : > { %v583_v3 = vadd.f32 %v1275_v2, %v1661_v21  ;;  %v574_v4 = vpop.f32.mrb[13].mxu0  ;;  %1305 = vmatprep.subr.bf16.mxu1 %v1396_v61 }
 0x141   : > { %v575_v5 = vadd.f32 %v1661_v21, %v574_v4  ;;  %v1276_v6 = vpop.f32.mrb[14].mxu0  ;;  %1293 = vmatprep.mubr.msk.bf16.mxu1 %vm652_vm0, %v609_v1 }
 0x142   : > { %v586_v7 = vadd.f32 %v1276_v6, %v1661_v21  ;;  %v577_v8 = vpop.f32.mrb[15].mxu0  ;;  %1294 = vmatmul.mubr.msk.bf16.gmra.mrb[4].mxu1 %vm652_vm0, %v610_v0  ;;  %v603_v10 = vmax.f32 %v583_v3, 0.0 }
 0x143   : > { %v578_v9 = vadd.f32 %v1661_v21, %v577_v8  ;;  %1306 = vmatpush3.bf16.msra.mxu1 %v1396_v61  ;;  %v601_v12 = vmax.f32 %v575_v5, 0.0 }
 0x144   : > { %v604_v11 = vmax.f32 %v586_v7, 0.0  ;;  %1307 = vmatprep.subr.bf16.mxu1 %v1397_v16 }
 0x145   : > { %v602_v13 = vmax.f32 %v578_v9, 0.0 }
 0x146   : > { %v612_v14 = vpack.c.bf16 %v604_v11, %v603_v10  ;;  %v1710_v10 = vld [vmem:[%s1823_s6] ss:$0 sm:$0xff] }
 0x147   : > { %v611_v15 = vpack.c.bf16 %v602_v13, %v601_v12  ;;  %1308 = vmatpush3.bf16.msra.mxu1 %v1397_v16  ;;  %v1717_v16 = vld [vmem:[%s1824_s7] ss:$0 sm:$0xff] }
 0x149   : > { %1297 = vmatprep.mubr.msk.bf16.mxu1 %vm652_vm0, %v611_v15 }
 0x14a   : > { %1298 = vmatmul.mubr.msk.bf16.gmra.mrb[8].mxu1 %vm652_vm0, %v612_v14 }
 0x205   : > { %v1287_v18 = vpop.f32.mrb[16].mxu0 }
 0x206   : > { %v720_v19 = vadd.f32 %v1287_v18, %v1175_v17  ;;  %v711_v20 = vpop.f32.mrb[17].mxu0 }
 0x207   : > { %v712_v21 = vadd.f32 %v1175_v17, %v711_v20  ;;  %v1288_v22 = vpop.f32.mrb[18].mxu0 }
 0x208   : > { %v723_v23 = vadd.f32 %v1288_v22, %v1175_v17  ;;  %v714_v24 = vpop.f32.mrb[19].mxu0  ;;  %v776_v26 = vmax.f32 %v720_v19, 0.0 }
 0x209   : > { %v715_v25 = vadd.f32 %v1175_v17, %v714_v24  ;;  %v774_v28 = vmax.f32 %v712_v21, 0.0 }
 0x20a   : > { %v777_v27 = vmax.f32 %v723_v23, 0.0 }
 0x20b   : > { %v775_v29 = vmax.f32 %v715_v25, 0.0 }
 0x20c   : > { %v791_v30 = vpack.c.bf16 %v777_v27, %v776_v26 }
 0x20d   : > { %v790_v31 = vpack.c.bf16 %v775_v29, %v774_v28  ;;  %v1291_v32 = vpop.f32.mrb[0].mxu1 }
 0x20e   : > { %v736_v33 = vadd.f32 %v1291_v32, %v1175_v17  ;;  %v727_v34 = vpop.f32.mrb[1].mxu1 }
 0x20f   : > { %v728_v35 = vadd.f32 %v1175_v17, %v727_v34  ;;  %v1292_v36 = vpop.f32.mrb[2].mxu1  ;;  %1309 = vmatprep.mubr.msk.bf16.mxu1 %vm652_vm0, %v790_v31 }
 0x210   : > { %v739_v37 = vadd.f32 %v1292_v36, %v1175_v17  ;;  %v730_v38 = vpop.f32.mrb[3].mxu1  ;;  %1310 = vmatmul.mubr.msk.bf16.vlgmr.msra.gmra.mrb[12].mxu1 %vm652_vm0, %v791_v30  ;;  %v780_v40 = vmax.f32 %v736_v33, 0.0 }
 0x211   : > { %v731_v39 = vadd.f32 %v1175_v17, %v730_v38  ;;  %v778_v42 = vmax.f32 %v728_v35, 0.0 }
 0x212   : > { %v781_v41 = vmax.f32 %v739_v37, 0.0 }
 0x213   : > { %v779_v43 = vmax.f32 %v731_v39, 0.0 }
 0x214   : > { %v793_v44 = vpack.c.bf16 %v781_v41, %v780_v40 }
 0x215   : > { %v792_v45 = vpack.c.bf16 %v779_v43, %v778_v42  ;;  %v1295_v46 = vpop.f32.mrb[4].mxu1 }
 0x216   : > { %v752_v47 = vadd.f32 %v1295_v46, %v1175_v17  ;;  %v743_v48 = vpop.f32.mrb[5].mxu1 }
 0x217   : > { %v744_v49 = vadd.f32 %v1175_v17, %v743_v48  ;;  %v1296_v50 = vpop.f32.mrb[6].mxu1  ;;  %1313 = vmatprep.mubr.msk.bf16.mxu1 %vm652_vm0, %v792_v45 }
 0x218   : > { %v755_v51 = vadd.f32 %v1296_v50, %v1175_v17  ;;  %v746_v52 = vpop.f32.mrb[7].mxu1  ;;  %1314 = vmatmul.mubr.msk.bf16.gmra.mrb[16].mxu1 %vm652_vm0, %v793_v44  ;;  %v784_v54 = vmax.f32 %v752_v47, 0.0 }
 0x219   : > { %v747_v53 = vadd.f32 %v1175_v17, %v746_v52  ;;  %v782_v56 = vmax.f32 %v744_v49, 0.0 }
 0x21a   : > { %v785_v55 = vmax.f32 %v755_v51, 0.0 }
 0x21b   : > { %v783_v57 = vmax.f32 %v747_v53, 0.0 }
 0x21c   : > { %v795_v58 = vpack.c.bf16 %v785_v55, %v784_v54 }
 0x21d   : > { %v794_v59 = vpack.c.bf16 %v783_v57, %v782_v56  ;;  %v1299_v60 = vpop.f32.mrb[8].mxu1 }
 0x21e   : > { %v768_v61 = vadd.f32 %v1299_v60, %v1175_v17  ;;  %v759_v62 = vpop.f32.mrb[9].mxu1 }
 0x21f   : > { %v760_v63 = vadd.f32 %v1175_v17, %v759_v62  ;;  %v1300_v0 = vpop.f32.mrb[10].mxu1  ;;  %1317 = vmatprep.mubr.msk.bf16.mxu1 %vm652_vm0, %v794_v59 }
 0x220   : > { %v771_v1 = vadd.f32 %v1300_v0, %v1175_v17  ;;  %v762_v2 = vpop.f32.mrb[11].mxu1  ;;  %1318 = vmatmul.mubr.msk.bf16.gmra.mrb[20].mxu1 %vm652_vm0, %v795_v58  ;;  %v788_v4 = vmax.f32 %v768_v61, 0.0 }
 0x221   : > { %v763_v3 = vadd.f32 %v1175_v17, %v762_v2  ;;  %v786_v6 = vmax.f32 %v760_v63, 0.0 }
 0x222   : > { %v789_v5 = vmax.f32 %v771_v1, 0.0 }
 0x223   : > { %v787_v7 = vmax.f32 %v763_v3, 0.0 }
 0x224   : > { %v797_v8 = vpack.c.bf16 %v789_v5, %v788_v4 }
 0x225   : > { %v796_v9 = vpack.c.bf16 %v787_v7, %v786_v6 }
 0x227   : > { %1321 = vmatprep.mubr.msk.bf16.mxu1 %vm652_vm0, %v796_v9 }
 0x228   : > { %1322 = vmatmul.mubr.msk.bf16.gmra.mrb[24].mxu1 %vm652_vm0, %v797_v8 }
 0x2e3   : > { %v1311_v11 = vpop.f32.mrb[12].mxu1 }
 0x2e4   : > { %v904_v12 = vadd.f32 %v1311_v11, %v1710_v10  ;;  %v895_v13 = vpop.f32.mrb[13].mxu1 }
 0x2e5   : > { %v896_v14 = vadd.f32 %v1710_v10, %v895_v13  ;;  %v1312_v15 = vpop.f32.mrb[14].mxu1 }
 0x2e6   : > { %v960_v17 = vmax.f32 %v904_v12, 0.0  ;;  %v907_v18 = vadd.f32 %v1312_v15, %v1710_v10  ;;  %v898_v19 = vpop.f32.mrb[15].mxu1 }
 0x2e7   : > { %v958_v20 = vmax.f32 %v896_v14, 0.0  ;;  %v899_v21 = vadd.f32 %v1710_v10, %v898_v19 }
 0x2e8   : > { %v961_v22 = vmax.f32 %v907_v18, 0.0  ;;  %v983_v23 = vmul.f32 %v1717_v16, %v960_v17 }
 0x2e9   : > { %v959_v24 = vmax.f32 %v899_v21, 0.0  ;;  %v981_v25 = vmul.f32 %v1717_v16, %v958_v20 }
 0x2ea   : > { %v1003_v26 = vsel %vm652_vm0, %v983_v23, 0.0  ;;  %v984_v27 = vmul.f32 %v1717_v16, %v961_v22 }
 0x2eb   : > { %1004 = vadd.xlane.f32.xlu1 %v1003_v26  ;;  %v1315_v28 = vpop.f32.mrb[16].mxu1  ;;  %v997_v29 = vsel %vm652_vm0, %v981_v25, 0.0  ;;  %v982_v30 = vmul.f32 %v1717_v16, %v959_v24 }
 0x2ec   : > { %v920_v31 = vadd.f32 %v1315_v28, %v1710_v10  ;;  %v911_v32 = vpop.f32.mrb[17].mxu1  ;;  %998 = vadd.xlane.f32.xlu0 %v997_v29  ;;  %v1006_v38 = vsel %vm652_vm0, %v984_v27, 0.0  ;;  %v1046_v29 = vstv %s1045_s26 }
 0x2ed   : > { %v912_v33 = vadd.f32 %v1710_v10, %v911_v32  ;;  %v1316_v34 = vpop.f32.mrb[18].mxu1  ;;  %v1000_v41 = vsel %vm652_vm0, %v982_v30, 0.0 }
 0x2ee   : > { %v964_v35 = vmax.f32 %v920_v31, 0.0  ;;  %v923_v36 = vadd.f32 %v1316_v34, %v1710_v10  ;;  %v914_v37 = vpop.f32.mrb[19].mxu1 }
 0x2ef   : > { %v962_v39 = vmax.f32 %v912_v33, 0.0  ;;  %v915_v40 = vadd.f32 %v1710_v10, %v914_v37  ;;  %1007 = vadd.xlane.f32.xlu1 %v1006_v38 }
 0x2f0   : > { %v965_v42 = vmax.f32 %v923_v36, 0.0  ;;  %1001 = vadd.xlane.f32.xlu0 %v1000_v41  ;;  %v987_v43 = vmul.f32 %v1717_v16, %v964_v35 }
 0x2f1   : > { %v963_v44 = vmax.f32 %v915_v40, 0.0  ;;  %v985_v48 = vmul.f32 %v1717_v16, %v962_v39 }
 0x2f2   : > { %v1015_v45 = vsel %vm652_vm0, %v987_v43, 0.0  ;;  %v988_v46 = vmul.f32 %v1717_v16, %v965_v42 }
 0x2f3   : > { %v1319_v47 = vpop.f32.mrb[20].mxu1  ;;  %v986_v52 = vmul.f32 %v1717_v16, %v963_v44  ;;  %v1009_v60 = vsel %vm652_vm0, %v985_v48, 0.0 }
 0x2f4   : > { %v936_v49 = vadd.f32 %v1319_v47, %v1710_v10  ;;  %v927_v50 = vpop.f32.mrb[21].mxu1  ;;  %1016 = vadd.xlane.f32.xlu0 %v1015_v45  ;;  %v1018_v51 = vsel %vm652_vm0, %v988_v46, 0.0 }
 0x2f5   : > { %v928_v53 = vadd.f32 %v1710_v10, %v927_v50  ;;  %1019 = vadd.xlane.f32.xlu1 %v1018_v51  ;;  %v1320_v54 = vpop.f32.mrb[22].mxu1  ;;  %v1012_v62 = vsel %vm652_vm0, %v986_v52, 0.0 }
 0x2f6   : > { %v968_v55 = vmax.f32 %v936_v49, 0.0  ;;  %v939_v56 = vadd.f32 %v1320_v54, %v1710_v10  ;;  %v930_v57 = vpop.f32.mrb[23].mxu1 }
 0x2f7   : > { %v966_v58 = vmax.f32 %v928_v53, 0.0  ;;  %v931_v59 = vadd.f32 %v1710_v10, %v930_v57 }
 0x2f8   : > { %v969_v61 = vmax.f32 %v939_v56, 0.0  ;;  %1010 = vadd.xlane.f32.xlu0 %v1009_v60  ;;  %v991_v63 = vmul.f32 %v1717_v16, %v968_v55 }
 0x2f9   : > { %v967_v0 = vmax.f32 %v931_v59, 0.0  ;;  %1013 = vadd.xlane.f32.xlu1 %v1012_v62  ;;  %v989_v4 = vmul.f32 %v1717_v16, %v966_v58 }
 0x2fa   : > { %v1027_v1 = vsel %vm652_vm0, %v991_v63, 0.0  ;;  %v992_v2 = vmul.f32 %v1717_v16, %v969_v61 }
 0x2fb   : > { %v1323_v3 = vpop.f32.mrb[24].mxu1  ;;  %v990_v8 = vmul.f32 %v1717_v16, %v967_v0  ;;  %v1021_v18 = vsel %vm652_vm0, %v989_v4, 0.0 }
 0x2fc   : > { %v952_v5 = vadd.f32 %v1323_v3, %v1710_v10  ;;  %v943_v6 = vpop.f32.mrb[25].mxu1  ;;  %1028 = vadd.xlane.f32.xlu0 %v1027_v1  ;;  %v1030_v7 = vsel %vm652_vm0, %v992_v2, 0.0 }
 0x2fd   : > { %v944_v9 = vadd.f32 %v1710_v10, %v943_v6  ;;  %v1324_v11 = vpop.f32.mrb[26].mxu1  ;;  %1031 = vadd.xlane.f32.xlu1 %v1030_v7  ;;  %v1024_v19 = vsel %vm652_vm0, %v990_v8, 0.0 }
 0x2fe   : > { %v955_v12 = vadd.f32 %v1324_v11, %v1710_v10  ;;  %v946_v13 = vpop.f32.mrb[27].mxu1  ;;  %v972_v14 = vmax.f32 %v952_v5, 0.0 }
 0x2ff   : > { %v970_v15 = vmax.f32 %v944_v9, 0.0  ;;  %v947_v17 = vadd.f32 %v1710_v10, %v946_v13 }
 0x300   : > { %1022 = vadd.xlane.f32.xlu0 %v1021_v18  ;;  %v973_v20 = vmax.f32 %v955_v12, 0.0  ;;  %v995_v25 = vmul.f32 %v1717_v16, %v972_v14 }
 0x301   : > { %v971_v21 = vmax.f32 %v947_v17, 0.0  ;;  %1025 = vadd.xlane.f32.xlu1 %v1024_v19  ;;  %v993_v22 = vmul.f32 %v1717_v16, %v970_v15 }
 0x302   : > { %v996_v26 = vmul.f32 %v1717_v16, %v973_v20  ;;  %v1039_v27 = vsel %vm652_vm0, %v995_v25, 0.0 }
 0x303   : > { %v1033_v23 = vsel %vm652_vm0, %v993_v22, 0.0  ;;  %v994_v24 = vmul.f32 %v1717_v16, %v971_v21 }
 0x304   : > { %1034 = vadd.xlane.f32.xlu0 %v1033_v23  ;;  %v1042_v28 = vsel %vm652_vm0, %v996_v26, 0.0 }
 0x305   : > { %v1036_v10 = vsel %vm652_vm0, %v994_v24, 0.0 }
 0x306   : > { %1037 = vadd.xlane.f32.xlu1 %v1036_v10 }
 0x308   : > { %1040 = vadd.xlane.f32.xlu0 %v1039_v27 }
 0x30a   : > { %1043 = vadd.xlane.f32.xlu1 %v1042_v28 }
 0x378   : > { %v1005_v16 = vpop.xlane.xlu1 %1004 }
 0x379   : > { %v1049_v30 = vadd.f32 %v1046_v29, %v1005_v16  ;;  %v999_v31 = vpop.xlane.xlu0 %998 }
 0x37a   : > { %v1047_v32 = vadd.f32 %v1046_v29, %v999_v31 }
 0x37b   : > { %1066 = vst.msk [vmem:[%s1770_s11 + $0x10] sm:$0xff] %vm1063_vm1, %v1049_v30 }
 0x37c   : > { %1064 = vst.msk [vmem:[%s1770_s11] sm:$0xff] %vm1063_vm1, %v1047_v32  ;;  %v1008_v33 = vpop.xlane.xlu1 %1007 }
 0x37d   : > { %v1050_v34 = vadd.f32 %v1046_v29, %v1008_v33  ;;  %v1002_v35 = vpop.xlane.xlu0 %1001 }
 0x37e   : > { %v1048_v36 = vadd.f32 %v1046_v29, %v1002_v35 }
 0x37f   : > { %1067 = vst.msk [vmem:[%s1770_s11 + $0x18] sm:$0xff] %vm1063_vm1, %v1050_v34 }
 0x380   : > { %1065 = vst.msk [vmem:[%s1770_s11 + $0x8] sm:$0xff] %vm1063_vm1, %v1048_v36 }
 0x381   : > { %v1017_v37 = vpop.xlane.xlu0 %1016 }
 0x382   : > { %v1053_v38 = vadd.f32 %v1046_v29, %v1017_v37  ;;  %v1020_v39 = vpop.xlane.xlu1 %1019 }
 0x383   : > { %v1054_v40 = vadd.f32 %v1046_v29, %v1020_v39 }
 0x384   : > { %1070 = vst.msk [vmem:[%s1770_s11 + $0x30] sm:$0xff] %vm1063_vm1, %v1053_v38 }
 0x385   : > { %1071 = vst.msk [vmem:[%s1770_s11 + $0x38] sm:$0xff] %vm1063_vm1, %v1054_v40  ;;  %v1011_v41 = vpop.xlane.xlu0 %1010 }
 0x386   : > { %v1051_v42 = vadd.f32 %v1046_v29, %v1011_v41  ;;  %v1014_v43 = vpop.xlane.xlu1 %1013 }
 0x387   : > { %v1052_v44 = vadd.f32 %v1046_v29, %v1014_v43 }
 0x388   : > { %1068 = vst.msk [vmem:[%s1770_s11 + $0x20] sm:$0xff] %vm1063_vm1, %v1051_v42 }
 0x389   : > { %1069 = vst.msk [vmem:[%s1770_s11 + $0x28] sm:$0xff] %vm1063_vm1, %v1052_v44  ;;  %v1029_v45 = vpop.xlane.xlu0 %1028 }
 0x38a   : > { %v1057_v46 = vadd.f32 %v1046_v29, %v1029_v45  ;;  %v1032_v47 = vpop.xlane.xlu1 %1031 }
 0x38b   : > { %v1058_v48 = vadd.f32 %v1046_v29, %v1032_v47 }
 0x38c   : > { %1074 = vst.msk [vmem:[%s1770_s11 + $0x50] sm:$0xff] %vm1063_vm1, %v1057_v46 }
 0x38d   : > { %1075 = vst.msk [vmem:[%s1770_s11 + $0x58] sm:$0xff] %vm1063_vm1, %v1058_v48  ;;  %v1023_v49 = vpop.xlane.xlu0 %1022 }
 0x38e   : > { %v1055_v50 = vadd.f32 %v1046_v29, %v1023_v49  ;;  %v1026_v51 = vpop.xlane.xlu1 %1025 }
 0x38f   : > { %v1056_v52 = vadd.f32 %v1046_v29, %v1026_v51 }
 0x390   : > { %1072 = vst.msk [vmem:[%s1770_s11 + $0x40] sm:$0xff] %vm1063_vm1, %v1055_v50 }
 0x391   : > { %1073 = vst.msk [vmem:[%s1770_s11 + $0x48] sm:$0xff] %vm1063_vm1, %v1056_v52  ;;  %v1035_v53 = vpop.xlane.xlu0 %1034 }
 0x392   : > { %v1059_v54 = vadd.f32 %v1046_v29, %v1035_v53 }
 0x393   : > { %v1038_v55 = vpop.xlane.xlu1 %1037 }
 0x394   : > { %1076 = vst.msk [vmem:[%s1770_s11 + $0x60] sm:$0xff] %vm1063_vm1, %v1059_v54  ;;  %v1060_v56 = vadd.f32 %v1046_v29, %v1038_v55 }
 0x395   : > { %v1041_v57 = vpop.xlane.xlu0 %1040 }
 0x396   : > { %1077 = vst.msk [vmem:[%s1770_s11 + $0x68] sm:$0xff] %vm1063_vm1, %v1060_v56  ;;  %v1061_v58 = vadd.f32 %v1046_v29, %v1041_v57 }
 0x397   : > { %v1044_v59 = vpop.xlane.xlu1 %1043 }
 0x398   : > { %1078 = vst.msk [vmem:[%s1770_s11 + $0x70] sm:$0xff] %vm1063_vm1, %v1061_v58  ;;  %v1062_v60 = vadd.f32 %v1046_v29, %v1044_v59 }
 0x39a   : > { %1079 = vst.msk [vmem:[%s1770_s11 + $0x78] sm:$0xff] %vm1063_vm1, %v1062_v60 }
 0x39b PF: > { %p20_p8 = scmp.ge.s32.totalorder %s1540_s15, 4   ;;  %s1830_s11 = smov %s1454_s12 }
 0x39c   : > { %s1831_s12 = smov %s1458_s13  ;;  %s1832_s13 = smov %s1550_s18 }
 0x39d   : > { %s1833_s14 = smov %s1540_s15  ;;  %22 = sbr.rel (!%p20_p8) target bundleno = 5 (0x5), region = 96 }
 0x3a4   :  { %1102 = vsyncpa [#allocation4], 1 }
 0x3a5   :  { %1104 = vsyncpa [#allocation4 + $0x1], 1 }

</bundles_post_ra>
